<compile_context>
chip_gen: v5e
topology: v5e:2x2
jax: 0.10.0
libtpu: 0.0.40
codegen_flags: <defaults>
</compile_context>

<pallas_src>
import functools

import jax
import jax.numpy as jnp
from jax.experimental import pallas as pl
from jax.experimental.pallas import tpu as pltpu

BN_EPS = 1e-5


def _round_up(x, m):
    return (x + m - 1) // m * m


def _vmem_limit(nbytes):
    # generous headroom, but capped so the same config is legal on v7x (64 MiB).
    return int(min(max(int(nbytes * 1.25) + (2 << 20), 16 << 20), 56 << 20))


# ----------------------------------------------------------------------------
# Fused single-kernel path: y lives in a VMEM scratch (bf16), no HBM round-trip.
# grid = (phase in {0: proj+stats, 1: BN apply}, row-tile index)
# ----------------------------------------------------------------------------
def _fused_kernel(xg_ref, rp_ref, wx_ref, wp_ref, gamma_ref, beta_ref,
                  out_ref,
                  y_scr, sum_scr, ssq_scr, scale_scr, shift_scr,
                  *, n_rows, tile, inv_count):
    phase = pl.program_id(0)
    it = pl.program_id(1)

    @pl.when(phase == 0)
    def _proj_and_stats():
        @pl.when(it == 0)
        def _():
            sum_scr[...] = jnp.zeros_like(sum_scr)
            ssq_scr[...] = jnp.zeros_like(ssq_scr)

        # in-kernel bf16 cast (VPU filler); f32 MXU accumulation.
        y = jnp.dot(xg_ref[...].astype(jnp.bfloat16), wx_ref[...],
                    preferred_element_type=jnp.float32)
        y = y + jnp.dot(rp_ref[...].astype(jnp.bfloat16), wp_ref[...],
                        preferred_element_type=jnp.float32)
        yb = y.astype(jnp.bfloat16)          # bf16 y halves on-chip bytes
        yf = yb.astype(jnp.float32)          # stats on exactly the stored values

        # mask rows past the true row count (ragged last tile, no pre-padding)
        row = it * tile + jax.lax.broadcasted_iota(jnp.int32, (tile, 1), 0)
        ym = jnp.where(row < n_rows, yf, 0.0)
        sum_scr[...] += jnp.sum(ym, axis=0, keepdims=True)
        ssq_scr[...] += jnp.sum(ym * ym, axis=0, keepdims=True)

        y_scr[it] = yb                       # VMEM-resident y

    @pl.when(phase == 1)
    def _bn_apply():
        @pl.when(it == 0)
        def _():
            mean = sum_scr[...] * inv_count
            var = jnp.maximum(ssq_scr[...] * inv_count - mean * mean, 0.0)
            scale = gamma_ref[...] * jax.lax.rsqrt(var + BN_EPS)
            scale_scr[...] = scale
            shift_scr[...] = beta_ref[...] - mean * scale

        yf = y_scr[it].astype(jnp.float32)
        out_ref[...] = (yf * scale_scr[...] + shift_scr[...]).astype(out_ref.dtype)


# ----------------------------------------------------------------------------
# Two-pass fallback (y too large for VMEM): pass 1 writes y in bf16 + stats,
# scale/shift computed once in a tiny XLA op, pass 2 applies them.
# ----------------------------------------------------------------------------
def _proj_stats_kernel(xg_ref, rp_ref, wx_ref, wp_ref,
                       y_ref, sum_ref, ssq_ref, *, n_rows, tile):
    it = pl.program_id(0)

    @pl.when(it == 0)
    def _():
        sum_ref[...] = jnp.zeros_like(sum_ref)
        ssq_ref[...] = jnp.zeros_like(ssq_ref)

    y = jnp.dot(xg_ref[...].astype(jnp.bfloat16), wx_ref[...],
                preferred_element_type=jnp.float32)
    y = y + jnp.dot(rp_ref[...].astype(jnp.bfloat16), wp_ref[...],
                    preferred_element_type=jnp.float32)
    yb = y.astype(jnp.bfloat16)
    yf = yb.astype(jnp.float32)

    row = it * tile + jax.lax.broadcasted_iota(jnp.int32, (tile, 1), 0)
    ym = jnp.where(row < n_rows, yf, 0.0)
    sum_ref[...] += jnp.sum(ym, axis=0, keepdims=True)
    ssq_ref[...] += jnp.sum(ym * ym, axis=0, keepdims=True)

    y_ref[...] = yb


def _bn_apply_kernel(y_ref, scale_ref, shift_ref, out_ref):
    out_ref[...] = (y_ref[...].astype(jnp.float32) * scale_ref[...]
                    + shift_ref[...]).astype(out_ref.dtype)


# ----------------------------------------------------------------------------
# Wrapper
# ----------------------------------------------------------------------------
def ball_pooling_forward(x, pos, batch_idx, params, stride, *,
                         row_tile=512,                 # raise to 1024-2048 on v5e/v6e
                         fused_vmem_budget=40 << 20,   # y-scratch budget (v7x-safe)
                         force_two_pass=False):
    """Returns (pooled_x, centers, pooled_batch_idx)."""
    if stride == 1:
        return x, pos, batch_idx

    N, in_dim = x.shape
    D = pos.shape[1]
    assert N % stride == 0, "N must be divisible by stride"
    n = N // stride

    # b is ignored on purpose: training-mode BN subtracts the per-channel batch
    # mean, which cancels any constant per-channel bias exactly.
    W, _b, gamma, beta = params
    Kx, Kp = stride * in_dim, stride * D
    K, out_dim = W.shape
    assert K == Kx + Kp

    # --- glue (matches the torch.no_grad() block + rearranges) ---
    pos_g = pos.reshape(n, stride, D)
    centers = jnp.mean(pos_g, axis=1)                        # (n s) d -> n d
    rel_pos = (pos_g - centers[:, None, :]).reshape(n, Kp)   # n s d -> n (s d)
    x_g = x.reshape(n, Kx)                                   # contiguous: no copy
    batch_idx_p = batch_idx[::stride]

    # --- small, channel-padded (lane-dense) weights / affine params ---
    C_pad = _round_up(out_dim, 128)
    Wb = W.astype(jnp.bfloat16)
    W_x = jnp.zeros((Kx, C_pad), jnp.bfloat16).at[:, :out_dim].set(Wb[:Kx])
    W_p = jnp.zeros((Kp, C_pad), jnp.bfloat16).at[:, :out_dim].set(Wb[Kx:])
    gamma_p = jnp.zeros((1, C_pad), jnp.float32).at[:, :out_dim].set(
        gamma.reshape(1, -1).astype(jnp.float32))
    beta_p = jnp.zeros((1, C_pad), jnp.float32).at[:, :out_dim].set(
        beta.reshape(1, -1).astype(jnp.float32))

    # --- tail-padding-aware tiling: tile | row_tile, <= 7 wasted rows/tile ---
    row_tile = _round_up(row_tile, 8)
    num_tiles = max(1, pl.cdiv(n, row_tile))
    tile = _round_up(pl.cdiv(n, num_tiles), 8)   # <= row_tile, multiple of 8
    inv_count = 1.0 / n

    fused_bytes = (num_tiles * tile * C_pad * 2        # bf16 y scratch
                   + 2 * tile * (Kx + Kp) * 4          # f32 input double buffers
                   + 2 * (Kx + Kp) * C_pad * 2         # weights
                   + 2 * tile * C_pad * 4              # output double buffer
                   + 8 * C_pad * 4)
    use_fused = (not force_two_pass) and fused_bytes <= fused_vmem_budget

    if use_fused:
        out_pad = pl.pallas_call(
            functools.partial(_fused_kernel, n_rows=n, tile=tile,
                              inv_count=inv_count),
            out_shape=jax.ShapeDtypeStruct((n, C_pad), jnp.float32),
            grid=(2, num_tiles),
            in_specs=[
                # phase 0 streams row tiles; phase 1 pins block 0 (no refetch)
                pl.BlockSpec((tile, Kx), lambda p, i: (i * (1 - p), 0)),
                pl.BlockSpec((tile, Kp), lambda p, i: (i * (1 - p), 0)),
                pl.BlockSpec((Kx, C_pad), lambda p, i: (0, 0)),
                pl.BlockSpec((Kp, C_pad), lambda p, i: (0, 0)),
                pl.BlockSpec((1, C_pad), lambda p, i: (0, 0)),
                pl.BlockSpec((1, C_pad), lambda p, i: (0, 0)),
            ],
            # phase 0 never touches the output (block index pinned to 0);
            # phase 1 writes each tile exactly once.
            out_specs=pl.BlockSpec((tile, C_pad), lambda p, i: (i * p, 0)),
            scratch_shapes=[
                pltpu.VMEM((num_tiles, tile, C_pad), jnp.bfloat16),  # y
                pltpu.VMEM((1, C_pad), jnp.float32),                 # sum
                pltpu.VMEM((1, C_pad), jnp.float32),                 # sumsq
                pltpu.VMEM((1, C_pad), jnp.float32),                 # scale
                pltpu.VMEM((1, C_pad), jnp.float32),                 # shift
            ],
            compiler_params=pltpu.CompilerParams(
                dimension_semantics=("arbitrary", "arbitrary"),
                vmem_limit_bytes=_vmem_limit(fused_bytes)),
        )(x_g, rel_pos, W_x, W_p, gamma_p, beta_p)
    else:
        p1_bytes = (2 * tile * (Kx + Kp) * 4 + 2 * (Kx + Kp) * C_pad * 2
                    + 2 * tile * C_pad * 2 + 8 * C_pad * 4)
        y, s, ssq = pl.pallas_call(
            functools.partial(_proj_stats_kernel, n_rows=n, tile=tile),
            out_shape=(
                jax.ShapeDtypeStruct((n, C_pad), jnp.bfloat16),   # bf16 y to HBM
                jax.ShapeDtypeStruct((1, C_pad), jnp.float32),
                jax.ShapeDtypeStruct((1, C_pad), jnp.float32),
            ),
            grid=(num_tiles,),
            in_specs=[
                pl.BlockSpec((tile, Kx), lambda i: (i, 0)),
                pl.BlockSpec((tile, Kp), lambda i: (i, 0)),
                pl.BlockSpec((Kx, C_pad), lambda i: (0, 0)),
                pl.BlockSpec((Kp, C_pad), lambda i: (0, 0)),
            ],
            out_specs=(
                pl.BlockSpec((tile, C_pad), lambda i: (i, 0)),
                pl.BlockSpec((1, C_pad), lambda i: (0, 0)),   # resident accumulator
                pl.BlockSpec((1, C_pad), lambda i: (0, 0)),   # resident accumulator
            ),
            compiler_params=pltpu.CompilerParams(
                dimension_semantics=("arbitrary",),
                vmem_limit_bytes=_vmem_limit(p1_bytes)),
        )(x_g, rel_pos, W_x, W_p)

        # scale/shift precomputed once (tiny O(C) XLA op, incl. the rsqrt)
        mean = s * inv_count
        var = jnp.maximum(ssq * inv_count - mean * mean, 0.0)
        scale = gamma_p * jax.lax.rsqrt(var + BN_EPS)
        shift = beta_p - mean * scale

        p2_bytes = 2 * tile * C_pad * 2 + 2 * tile * C_pad * 4 + 4 * C_pad * 4
        out_pad = pl.pallas_call(
            _bn_apply_kernel,
            out_shape=jax.ShapeDtypeStruct((n, C_pad), jnp.float32),
            grid=(num_tiles,),
            in_specs=[
                pl.BlockSpec((tile, C_pad), lambda i: (i, 0)),
                pl.BlockSpec((1, C_pad), lambda i: (0, 0)),
                pl.BlockSpec((1, C_pad), lambda i: (0, 0)),
            ],
            out_specs=pl.BlockSpec((tile, C_pad), lambda i: (i, 0)),
            compiler_params=pltpu.CompilerParams(
                dimension_semantics=("parallel",),
                vmem_limit_bytes=_vmem_limit(p2_bytes)),
        )(y, scale, shift)

    # channel slice only (rows already exact). Downstream consumers could take
    # the lane-padded buffer directly to skip this XLA pass.
    pooled = out_pad[:, :out_dim]
    return pooled, centers, batch_idx_p


def init_params(key, in_dim, out_dim, stride, dimensionality):
    """Deterministic init mimicking nn.Linear defaults; BN gamma=1, beta=0."""
    K = stride * in_dim + stride * dimensionality
    k_w, k_b = jax.random.split(key)
    bound = 1.0 / jnp.sqrt(K)
    W = jax.random.uniform(k_w, (K, out_dim), jnp.float32, -bound, bound)
    b = jax.random.uniform(k_b, (1, out_dim), jnp.float32, -bound, bound)
    gamma = jnp.ones((1, out_dim), jnp.float32)
    beta = jnp.zeros((1, out_dim), jnp.float32)
    return W, b, gamma, beta


if __name__ == "__main__":
    # Small shapes: N=64 leaf nodes, in_dim=8, out_dim=16, stride=4 -> n=16.
    in_dim, out_dim, stride, dim = 8, 16, 4, 3
    N = 64

    key = jax.random.PRNGKey(0)
    k_x, k_pos, k_par = jax.random.split(key, 3)
    x = jax.random.normal(k_x, (N, in_dim), jnp.float32)
    pos = jax.random.normal(k_pos, (N, dim), jnp.float32)
    batch_idx = jnp.repeat(jnp.arange(2, dtype=jnp.int32), N // 2)

    params = init_params(k_par, in_dim, out_dim, stride, dim)

    # primary (fused, VMEM-resident y) path
    pooled_x, centers, pooled_batch = ball_pooling_forward(
        x, pos, batch_idx, params, stride)
    # two-pass fallback path (bf16 y via HBM) — exercised for coverage
    pooled_x2, _, _ = ball_pooling_forward(
        x, pos, batch_idx, params, stride, force_two_pass=True)
    jax.block_until_ready((pooled_x, pooled_x2, centers, pooled_batch))

    # Pure-JAX reference (training-mode BatchNorm1d, biased variance).
    # The matmul uses bf16 inputs / f32 accumulation and its result is rounded
    # to bf16 (matching the kernel's bf16 y storage).  The Linear bias is added
    # afterwards to confirm that training-mode BN cancels it exactly.
    n = N // stride
    W, b, gamma, beta = params
    pos_g = pos.reshape(n, stride, dim)
    centers_ref = pos_g.mean(axis=1)
    rel = (pos_g - centers_ref[:, None, :]).reshape(n, stride * dim)
    xcat = jnp.concatenate([x.reshape(n, stride * in_dim), rel], axis=1)
    y = jnp.dot(xcat.astype(jnp.bfloat16), W.astype(jnp.bfloat16),
                preferred_element_type=jnp.float32)
    y = y.astype(jnp.bfloat16).astype(jnp.float32) + b
    mu = y.mean(0, keepdims=True)
    var = ((y - mu) ** 2).mean(0, keepdims=True)
    y_ref = (y - mu) / jnp.sqrt(var + BN_EPS) * gamma + beta

    assert pooled_x.shape == (n, out_dim)
    assert centers.shape == (n, dim)
    assert pooled_batch.shape == (n,)
    assert jnp.allclose(pooled_x, y_ref, atol=1e-2, rtol=1e-2)
    assert jnp.allclose(pooled_x2, y_ref, atol=1e-2, rtol=1e-2)
    assert jnp.allclose(centers, centers_ref, atol=1e-5)
    print("KERNEL_OK")
</pallas_src>

<mosaic_0001>
module attributes {stable_mosaic.version = 11 : i64} {
  func.func @_fused_kernel(%arg0: i32, %arg1: i32, %arg2: memref<16x32xf32, #tpu.memory_space<vmem>>, %arg3: memref<16x12xf32, #tpu.memory_space<vmem>>, %arg4: memref<32x128xbf16, #tpu.memory_space<vmem>>, %arg5: memref<12x128xbf16, #tpu.memory_space<vmem>>, %arg6: memref<1x128xf32, #tpu.memory_space<vmem>>, %arg7: memref<1x128xf32, #tpu.memory_space<vmem>>, %arg8: memref<16x128xf32, #tpu.memory_space<vmem>>, %arg9: memref<1x16x128xbf16, #tpu.memory_space<vmem>>, %arg10: memref<1x128xf32, #tpu.memory_space<vmem>>, %arg11: memref<1x128xf32, #tpu.memory_space<vmem>>, %arg12: memref<1x128xf32, #tpu.memory_space<vmem>>, %arg13: memref<1x128xf32, #tpu.memory_space<vmem>>) attributes {dimension_semantics = [#tpu.dimension_semantics<arbitrary>, #tpu.dimension_semantics<arbitrary>], iteration_bounds = array<i64: 2, 1>, scalar_prefetch = 0 : i64, scratch_operands = 5 : i64, tpu.core_type = #tpu.core_type<tc>, window_params = [{transform_indices = @transform_0, window_bounds = array<i64: 16, 32>}, {transform_indices = @transform_1, window_bounds = array<i64: 16, 12>}, {pipeline_mode = #tpu.pipeline_mode<synchronous>, transform_indices = @transform_2, window_bounds = array<i64: 32, 128>}, {pipeline_mode = #tpu.pipeline_mode<synchronous>, transform_indices = @transform_3, window_bounds = array<i64: 12, 128>}, {pipeline_mode = #tpu.pipeline_mode<synchronous>, transform_indices = @transform_4, window_bounds = array<i64: 1, 128>}, {pipeline_mode = #tpu.pipeline_mode<synchronous>, transform_indices = @transform_5, window_bounds = array<i64: 1, 128>}, {transform_indices = @transform_6, window_bounds = array<i64: 16, 128>}]} {
    %c0_i32 = arith.constant 0 : i32
    %0 = arith.cmpi eq, %arg0, %c0_i32 : i32
    %1 = arith.extui %0 : i1 to i32
    %c0_i32_0 = arith.constant 0 : i32
    %2 = arith.cmpi ne, %1, %c0_i32_0 : i32
    scf.if %2 {
      %c0_i32_2 = arith.constant 0 : i32
      %6 = arith.cmpi eq, %arg1, %c0_i32_2 : i32
      %7 = arith.extui %6 : i1 to i32
      %c0_i32_3 = arith.constant 0 : i32
      %8 = arith.cmpi ne, %7, %c0_i32_3 : i32
      scf.if %8 {
        %cst_26 = arith.constant 0.000000e+00 : f32
        %45 = vector.broadcast %cst_26 : f32 to vector<1x128xf32>
        %c0_27 = arith.constant 0 : index
        %c0_28 = arith.constant 0 : index
        %46 = vector.load %arg10[%c0_27, %c0_28] : memref<1x128xf32, #tpu.memory_space<vmem>>, vector<1x128xf32>
        tpu.vector_store %arg10[%c0_27, %c0_28], %45 {strides = array<i32>} : memref<1x128xf32, #tpu.memory_space<vmem>>, vector<1x128xf32>,
        %cst_29 = arith.constant 0.000000e+00 : f32
        %47 = vector.broadcast %cst_29 : f32 to vector<1x128xf32>
        %c0_30 = arith.constant 0 : index
        %c0_31 = arith.constant 0 : index
        %48 = vector.load %arg11[%c0_30, %c0_31] : memref<1x128xf32, #tpu.memory_space<vmem>>, vector<1x128xf32>
        tpu.vector_store %arg11[%c0_30, %c0_31], %47 {strides = array<i32>} : memref<1x128xf32, #tpu.memory_space<vmem>>, vector<1x128xf32>,
      } else {
      }
      %c0 = arith.constant 0 : index
      %c0_4 = arith.constant 0 : index
      %9 = vector.load %arg2[%c0, %c0_4] : memref<16x32xf32, #tpu.memory_space<vmem>>, vector<16x32xf32>
      %10 = arith.truncf %9 : vector<16x32xf32> to vector<16x32xbf16>
      %c0_5 = arith.constant 0 : index
      %c0_6 = arith.constant 0 : index
      %11 = vector.load %arg4[%c0_5, %c0_6] : memref<32x128xbf16, #tpu.memory_space<vmem>>, vector<32x128xbf16>
      %cst = arith.constant dense<0.000000e+00> : vector<16x128xf32>
      %12 = tpu.matmul %10, %11, %cst {dimension_numbers = #tpu.dot_dimension_numbers<[1], [0], [0], [1], [0, 0, 1, 1], [], []>} : vector<16x32xbf16>, vector<32x128xbf16>, vector<16x128xf32> -> vector<16x128xf32>
      %c0_7 = arith.constant 0 : index
      %c0_8 = arith.constant 0 : index
      %13 = vector.load %arg3[%c0_7, %c0_8] : memref<16x12xf32, #tpu.memory_space<vmem>>, vector<16x12xf32>
      %14 = arith.truncf %13 : vector<16x12xf32> to vector<16x12xbf16>
      %c0_9 = arith.constant 0 : index
      %c0_10 = arith.constant 0 : index
      %15 = vector.load %arg5[%c0_9, %c0_10] : memref<12x128xbf16, #tpu.memory_space<vmem>>, vector<12x128xbf16>
      %cst_11 = arith.constant dense<0.000000e+00> : vector<16x128xf32>
      %16 = tpu.matmul %14, %15, %cst_11 {dimension_numbers = #tpu.dot_dimension_numbers<[1], [0], [0], [1], [0, 0, 1, 1], [], []>} : vector<16x12xbf16>, vector<12x128xbf16>, vector<16x128xf32> -> vector<16x128xf32>
      %17 = arith.addf %12, %16 : vector<16x128xf32>
      %18 = arith.truncf %17 : vector<16x128xf32> to vector<16x128xbf16>
      %19 = arith.extf %18 : vector<16x128xbf16> to vector<16x128xf32>
      %c16_i32 = arith.constant 16 : i32
      %20 = arith.muli %arg1, %c16_i32 : i32
      %21 = tpu.iota {dimensions = array<i32: 0>} : vector<16x1xi32>
      %22 = vector.broadcast %20 : i32 to vector<16x1xi32>
      %23 = arith.addi %22, %21 : vector<16x1xi32>
      %c16_i32_12 = arith.constant 16 : i32
      %24 = vector.broadcast %c16_i32_12 : i32 to vector<16x1xi32>
      %25 = arith.cmpi slt, %23, %24 : vector<16x1xi32>
      %cst_13 = arith.constant 0.000000e+00 : f32
      %26 = vector.shape_cast %25 : vector<16x1xi1> to vector<16x1xi1>
      %27 = vector.broadcast %26 : vector<16x1xi1> to vector<16x128xi1>
      %28 = vector.broadcast %cst_13 : f32 to vector<16x128xf32>
      %29 = arith.select %27, %19, %28 : vector<16x128xi1>, vector<16x128xf32>
      %c0_14 = arith.constant 0 : index
      %c0_15 = arith.constant 0 : index
      %30 = vector.load %arg10[%c0_14, %c0_15] : memref<1x128xf32, #tpu.memory_space<vmem>>, vector<1x128xf32>
      %cst_16 = arith.constant dense<0.000000e+00> : vector<128xf32>
      %31 = vector.multi_reduction <add>, %29, %cst_16 [0] : vector<16x128xf32> to vector<128xf32>
      %32 = vector.shape_cast %31 : vector<128xf32> to vector<1x128xf32>
      %33 = arith.addf %30, %32 : vector<1x128xf32>
      %c0_17 = arith.constant 0 : index
      %c0_18 = arith.constant 0 : index
      %34 = vector.load %arg10[%c0_17, %c0_18] : memref<1x128xf32, #tpu.memory_space<vmem>>, vector<1x128xf32>
      tpu.vector_store %arg10[%c0_17, %c0_18], %33 {strides = array<i32>} : memref<1x128xf32, #tpu.memory_space<vmem>>, vector<1x128xf32>,
      %c0_19 = arith.constant 0 : index
      %c0_20 = arith.constant 0 : index
      %35 = vector.load %arg11[%c0_19, %c0_20] : memref<1x128xf32, #tpu.memory_space<vmem>>, vector<1x128xf32>
      %36 = arith.mulf %29, %29 : vector<16x128xf32>
      %cst_21 = arith.constant dense<0.000000e+00> : vector<128xf32>
      %37 = vector.multi_reduction <add>, %36, %cst_21 [0] : vector<16x128xf32> to vector<128xf32>
      %38 = vector.shape_cast %37 : vector<128xf32> to vector<1x128xf32>
      %39 = arith.addf %35, %38 : vector<1x128xf32>
      %c0_22 = arith.constant 0 : index
      %c0_23 = arith.constant 0 : index
      %40 = vector.load %arg11[%c0_22, %c0_23] : memref<1x128xf32, #tpu.memory_space<vmem>>, vector<1x128xf32>
      tpu.vector_store %arg11[%c0_22, %c0_23], %39 {strides = array<i32>} : memref<1x128xf32, #tpu.memory_space<vmem>>, vector<1x128xf32>,
      %41 = arith.index_cast %arg1 : i32 to index
      %c0_24 = arith.constant 0 : index
      %c0_25 = arith.constant 0 : index
      %42 = vector.load %arg9[%41, %c0_24, %c0_25] : memref<1x16x128xbf16, #tpu.memory_space<vmem>>, vector<1x16x128xbf16>
      %43 = vector.shape_cast %42 : vector<1x16x128xbf16> to vector<16x128xbf16>
      %44 = vector.shape_cast %18 : vector<16x128xbf16> to vector<1x16x128xbf16>
      tpu.vector_store %arg9[%41, %c0_24, %c0_25], %44 {strides = array<i32>} : memref<1x16x128xbf16, #tpu.memory_space<vmem>>, vector<1x16x128xbf16>,
    } else {
    }
    %c1_i32 = arith.constant 1 : i32
    %3 = arith.cmpi eq, %arg0, %c1_i32 : i32
    %4 = arith.extui %3 : i1 to i32
    %c0_i32_1 = arith.constant 0 : i32
    %5 = arith.cmpi ne, %4, %c0_i32_1 : i32
    scf.if %5 {
      %c0_i32_2 = arith.constant 0 : i32
      %6 = arith.cmpi eq, %arg1, %c0_i32_2 : i32
      %7 = arith.extui %6 : i1 to i32
      %c0_i32_3 = arith.constant 0 : i32
      %8 = arith.cmpi ne, %7, %c0_i32_3 : i32
      scf.if %8 {
        %c0_11 = arith.constant 0 : index
        %c0_12 = arith.constant 0 : index
        %20 = vector.load %arg10[%c0_11, %c0_12] : memref<1x128xf32, #tpu.memory_space<vmem>>, vector<1x128xf32>
        %cst = arith.constant 6.250000e-02 : f32
        %21 = vector.broadcast %cst : f32 to vector<1x128xf32>
        %22 = arith.mulf %20, %21 : vector<1x128xf32>
        %c0_13 = arith.constant 0 : index
        %c0_14 = arith.constant 0 : index
        %23 = vector.load %arg11[%c0_13, %c0_14] : memref<1x128xf32, #tpu.memory_space<vmem>>, vector<1x128xf32>
        %cst_15 = arith.constant 6.250000e-02 : f32
        %24 = vector.broadcast %cst_15 : f32 to vector<1x128xf32>
        %25 = arith.mulf %23, %24 : vector<1x128xf32>
        %26 = arith.mulf %22, %22 : vector<1x128xf32>
        %27 = arith.subf %25, %26 : vector<1x128xf32>
        %cst_16 = arith.constant 0.000000e+00 : f32
        %28 = vector.broadcast %cst_16 : f32 to vector<1x128xf32>
        %29 = arith.maximumf %27, %28 : vector<1x128xf32>
        %c0_17 = arith.constant 0 : index
        %c0_18 = arith.constant 0 : index
        %30 = vector.load %arg6[%c0_17, %c0_18] : memref<1x128xf32, #tpu.memory_space<vmem>>, vector<1x128xf32>
        %cst_19 = arith.constant 9.99999974E-6 : f32
        %31 = vector.broadcast %cst_19 : f32 to vector<1x128xf32>
        %32 = arith.addf %29, %31 : vector<1x128xf32>
        %33 = math.rsqrt %32 : vector<1x128xf32>
        %34 = arith.mulf %30, %33 : vector<1x128xf32>
        %c0_20 = arith.constant 0 : index
        %c0_21 = arith.constant 0 : index
        %35 = vector.load %arg12[%c0_20, %c0_21] : memref<1x128xf32, #tpu.memory_space<vmem>>, vector<1x128xf32>
        tpu.vector_store %arg12[%c0_20, %c0_21], %34 {strides = array<i32>} : memref<1x128xf32, #tpu.memory_space<vmem>>, vector<1x128xf32>,
        %c0_22 = arith.constant 0 : index
        %c0_23 = arith.constant 0 : index
        %36 = vector.load %arg7[%c0_22, %c0_23] : memref<1x128xf32, #tpu.memory_space<vmem>>, vector<1x128xf32>
        %37 = arith.mulf %22, %34 : vector<1x128xf32>
        %38 = arith.subf %36, %37 : vector<1x128xf32>
        %c0_24 = arith.constant 0 : index
        %c0_25 = arith.constant 0 : index
        %39 = vector.load %arg13[%c0_24, %c0_25] : memref<1x128xf32, #tpu.memory_space<vmem>>, vector<1x128xf32>
        tpu.vector_store %arg13[%c0_24, %c0_25], %38 {strides = array<i32>} : memref<1x128xf32, #tpu.memory_space<vmem>>, vector<1x128xf32>,
      } else {
      }
      %9 = arith.index_cast %arg1 : i32 to index
      %c0 = arith.constant 0 : index
      %c0_4 = arith.constant 0 : index
      %10 = vector.load %arg9[%9, %c0, %c0_4] : memref<1x16x128xbf16, #tpu.memory_space<vmem>>, vector<1x16x128xbf16>
      %11 = vector.shape_cast %10 : vector<1x16x128xbf16> to vector<16x128xbf16>
      %12 = arith.extf %11 : vector<16x128xbf16> to vector<16x128xf32>
      %c0_5 = arith.constant 0 : index
      %c0_6 = arith.constant 0 : index
      %13 = vector.load %arg12[%c0_5, %c0_6] : memref<1x128xf32, #tpu.memory_space<vmem>>, vector<1x128xf32>
      %14 = vector.broadcast %13 : vector<1x128xf32> to vector<16x128xf32>
      %15 = arith.mulf %12, %14 : vector<16x128xf32>
      %c0_7 = arith.constant 0 : index
      %c0_8 = arith.constant 0 : index
      %16 = vector.load %arg13[%c0_7, %c0_8] : memref<1x128xf32, #tpu.memory_space<vmem>>, vector<1x128xf32>
      %17 = vector.broadcast %16 : vector<1x128xf32> to vector<16x128xf32>
      %18 = arith.addf %15, %17 : vector<16x128xf32>
      %c0_9 = arith.constant 0 : index
      %c0_10 = arith.constant 0 : index
      %19 = vector.load %arg8[%c0_9, %c0_10] : memref<16x128xf32, #tpu.memory_space<vmem>>, vector<16x128xf32>
      tpu.vector_store %arg8[%c0_9, %c0_10], %18 {strides = array<i32>} : memref<16x128xf32, #tpu.memory_space<vmem>>, vector<16x128xf32>,
    } else {
    }
    return
  }
  func.func @transform_0(%arg0: i32, %arg1: i32) -> (i32, i32) {
    %c1_i32 = arith.constant 1 : i32
    %0 = arith.subi %c1_i32, %arg0 : i32
    %1 = arith.muli %arg1, %0 : i32
    %c0_i32 = arith.constant 0 : i32
    %c0_i32_0 = arith.constant 0 : i32
    return %1, %c0_i32 : i32, i32
  }
  func.func @transform_1(%arg0: i32, %arg1: i32) -> (i32, i32) {
    %c1_i32 = arith.constant 1 : i32
    %0 = arith.subi %c1_i32, %arg0 : i32
    %1 = arith.muli %arg1, %0 : i32
    %c0_i32 = arith.constant 0 : i32
    %c0_i32_0 = arith.constant 0 : i32
    return %1, %c0_i32 : i32, i32
  }
  func.func @transform_2(%arg0: i32, %arg1: i32) -> (i32, i32) {
    %c0_i32 = arith.constant 0 : i32
    %c0_i32_0 = arith.constant 0 : i32
    %c0_i32_1 = arith.constant 0 : i32
    return %c0_i32, %c0_i32_0 : i32, i32
  }
  func.func @transform_3(%arg0: i32, %arg1: i32) -> (i32, i32) {
    %c0_i32 = arith.constant 0 : i32
    %c0_i32_0 = arith.constant 0 : i32
    %c0_i32_1 = arith.constant 0 : i32
    return %c0_i32, %c0_i32_0 : i32, i32
  }
  func.func @transform_4(%arg0: i32, %arg1: i32) -> (i32, i32) {
    %c0_i32 = arith.constant 0 : i32
    %c0_i32_0 = arith.constant 0 : i32
    %c0_i32_1 = arith.constant 0 : i32
    return %c0_i32, %c0_i32_0 : i32, i32
  }
  func.func @transform_5(%arg0: i32, %arg1: i32) -> (i32, i32) {
    %c0_i32 = arith.constant 0 : i32
    %c0_i32_0 = arith.constant 0 : i32
    %c0_i32_1 = arith.constant 0 : i32
    return %c0_i32, %c0_i32_0 : i32, i32
  }
  func.func @transform_6(%arg0: i32, %arg1: i32) -> (i32, i32) {
    %0 = arith.muli %arg1, %arg0 : i32
    %c0_i32 = arith.constant 0 : i32
    %c0_i32_0 = arith.constant 0 : i32
    return %0, %c0_i32 : i32, i32
  }
}

</mosaic_0001>

<bundles_post_ra>
// kernel: tpu_custom_call.1
= control target key start
LH: loop header
LB: loop body
LE: loop exit
PB: predicated region body
PF: predicated region fallthrough
CT: control target
= control target key end

     0   :  { %11 = vsyncpa [#allocation8], 0  ;;  %s1172_s0 = inlined_call_operand.hbm [shape: f32[16,32], index: 0, kind: input, shape index: {}]   ;;  %s1173_s1 = inlined_call_operand.hbm [shape: f32[16,12], index: 1, kind: input, shape index: {}]   ;;  %s1174_s2 = inlined_call_operand.hbm [shape: bf16[32,128], index: 2, kind: input, shape index: {}]   ;;  %s1175_s3 = inlined_call_operand.hbm [shape: bf16[12,128], index: 3, kind: input, shape index: {}]   ;;  %s1176_s4 = inlined_call_operand.vmem [shape: f32[1,128], index: 4, kind: input, shape index: {}]   ;;  %s1177_s5 = inlined_call_operand.vmem [shape: f32[1,128], index: 5, kind: input, shape index: {}]   ;;  %s1178_s6 = inlined_call_operand.hbm [shape: f32[16,128], index: 6, kind: output, shape index: {}]  }
   0x1   :  { %13 = vsyncpa [#allocation8 + $0x1], 0 }
   0x2   :  { %14 = vsyncpa [#allocation11], 0 }
   0x3   :  { %16 = vsyncpa [#allocation11 + $0x1], 0 }
   0x4   :  { %17 = vsyncpa [#allocation14], 0 }
   0x5   :  { %18 = vsyncpa [#allocation9], 0 }
   0x6   :  { %20 = vsyncpa [#allocation9 + $0x1], 0  ;;  %s1079_s21 = smov 0   ;;  %s1081_s22 = smov 0  }
   0x7   :  { %s1083_s23 = smov 0  }
   0x8 LB: > { %s1095_s24 = sadd.s32 4294967295, %s1030_s23   ;;  %s706_s25 = sadd.s32 4294967294, %s1030_s23   ;;  %s1030_s23 = sphi %s1083_s23, %s26_s23   ;;  %s1026_s22 = sphi %s1081_s22, %s1181_s22   ;;  %s1022_s21 = sphi %s1079_s21, %s1180_s21  }
   0x9   : > { %s38_s26 = sadd.s32 1, %s1026_s22  ;;  %p707_p0 = scmp.ge.s32.totalorder %s1030_s23, 1 }
   0xa   : > { %p40_p1 = scmp.ge.s32.totalorder %s38_s26, 2  ;;  %p215_p2 = scmp.lt.s32.totalorder %s1030_s23, 3 }
   0xb   : > { %p788_p3 = scmp.eq.s32.totalorder %s1095_s24, 0  ;;  %s226_s30 = sshll.u32 %s1174_s2, 4  ;;  %s227_s30 = int_to_ptr.hbm [resolvable:$true] %s226_s30 }
   0xc   : > { %s1183_s26 = smov (%p40_p1, %s38_s26), 0  ;;  %p1104_p4 = pnand %p707_p0, %p215_p2 }
   0xd   : > { %s1032_s7 = smov [#allocation12]   ;;  %p710_p7 = scmp.ge.s32.totalorder %s1030_s23, 2 }
   0xe   : > { %p770_p5 = pneg %p1104_p4  ;;  %s228_s8 = sshll.u32 %s1032_s7, 4  ;;  %s229_s8 = int_to_ptr.vmem [resolvable:$true] %s228_s8 }
   0xf   : > { %s240_s11 = sshll.u32 %s1175_s3, 4  ;;  %s1033_s12 = smov 64   ;;  %s241_s11 = int_to_ptr.hbm [resolvable:$true] %s240_s11 }
  0x10   : > { %p771_p6 = pnand %p788_p3, %p770_p5  ;;  %s1034_s13 = smov 4  }
  0x11   : > { %s1035_s14 = smov [#allocation13]   ;;  %p790_p8 = scmp.lt.s32.totalorder %s1030_s23, 2 }
  0x12   : > { %773 = dma.hbm_to_vmem [thread:$0]  (!%p771_p6), %s227_s30, 256, %s229_s8, [#allocation11], %s1033_s12, %s1033_s12, %s1034_s13  }
  0x13   : > { %s242_s15 = sshll.u32 %s1035_s14, 4  ;;  %p791_p9 = scmp.eq.s32.totalorder %s1030_s23, 0  ;;  %s243_s15 = int_to_ptr.vmem [resolvable:$true] %s242_s15 }
  0x14   : > { %776 = dma.hbm_to_vmem [thread:$0]  (!%p771_p6), %s241_s11, 128, %s243_s15, [#allocation14], %s1033_s12, %s1033_s12, %s1034_s13  }
  0x15   : > { %s274_s18 = sshll.u32 %s1172_s0, 4  ;;  %s1036_s19 = smov [#allocation7]   ;;  %s275_s18 = int_to_ptr.hbm [resolvable:$true] %s274_s18 }
  0x16   : > { %s276_s20 = sshll.u32 %s1036_s19, 4  ;;  %p778_p10 = pnand %p791_p9, %p790_p8  ;;  %s277_s20 = int_to_ptr.vmem [resolvable:$true] %s276_s20 }
  0x17   : > { %s286_s28 = sand.u32 1, %s1030_s23   ;;  %s1037_s29 = smov 128  }
  0x18   : > { %s1038_s7 = smov 8   ;;  %s298_s9 = sshll.u32 %s1173_s1, 4  ;;  %s299_s9 = int_to_ptr.hbm [resolvable:$true] %s298_s9 }
  0x19   : > { %780 = dma.hbm_to_vmem [thread:$0]  (!%p778_p10), %s275_s18, 256, %s277_s20, [#allocation8], %s1037_s29, %s1037_s29, %s1038_s7  }
  0x1a   : > { %s1039_s10 = smov [#allocation10]   ;;  %s287_s12 = scalar_lea.sflag [#allocation11], %s286_s28 }
  0x1b   : > { %s300_s11 = sshll.u32 %s1039_s10, 4  ;;  %312 = sbr.rel (%p1104_p4) target bundleno = 272 (0x110), region = 44  ;;  %s301_s11 = int_to_ptr.vmem [resolvable:$true] %s300_s11 }
  0x1c   : > { %783 = dma.hbm_to_vmem [thread:$0]  (!%p778_p10), %s299_s9, 256, %s301_s11, %s287_s12, %s1037_s29, %s1037_s29, %s1038_s7  }
  0x20   : > { %1001 = dma.done.wait (%p788_p3), [#allocation8], 256  }
  0x21   : > { %1003 = vsyncadd (%p788_p3), [#allocation8], 4294967040  ;;  %s324_s13 = sand.u32 1, %s1095_s24  }
  0x22   : > { %s325_s14 = scalar_lea.sflag [#allocation11], %s324_s13 }
  0x23   : > { %1005 = dma.done.wait (%p788_p3), %s325_s14, 256  }
  0x24   : > { %1007 = vsyncadd (%p788_p3), %s325_s14, 4294967040 }
  0x25   : > { %1009 = dma.done.wait (%p788_p3), [#allocation11], 256  }
  0x26   : > { %1011 = vsyncadd (%p788_p3), [#allocation11], 4294967040 }
  0x27   : > { %1013 = dma.done.wait (%p788_p3), [#allocation14], 128  }
  0x28   : > { %1015 = vsyncadd (%p788_p3), [#allocation14], 4294967168  ;;  %p718_p11 = scmp.ne.s32.totalorder %s1022_s21, 0 }
  0x2a   : > { %385 = sbr.rel (%p718_p11) target bundleno = 214 (0xd6), region = 64 }
  0x2f   : > { %v739_v0 = vld [vmem:[#allocation12 + $0x8] sm:$0xff]  ;;  %v721_v1 = vld [vmem:[#allocation13] sm:$0xf]  ;;  %v740_v2 = vld [vmem:[#allocation13] sm:$0x30]  ;;  %vm413_vm0 = vcmask 1045504  }
  0x30   : > { %v722_v3 = vor.u32 %v740_v2, %v721_v1  ;;  %v399_v4 = vld [vmem:[#allocation10] sm:$0xff]  ;;  %v400_v5 = vld [vmem:[#allocation10 + $0x8] sm:$0xff]  ;;  %453 = vmatpush.bf16.msra.mxu1 %v739_v0  ;;  %vm409_vm1 = vcmask 97280   ;;  %vm443_vm2 = vcmask 261120   ;;  %v1040_v12 = vmov 0.0  }
  0x31   : > { %v738_v6 = vld [vmem:[#allocation12] sm:$0xff]  ;;  %v393_v8 = vld [vmem:[#allocation7 + $0x8] sm:$0xff]  ;;  %v401_v10 = vpack.c.bf16 %v400_v5, %v399_v4  ;;  %390 = vst [vmem:[#allocation3] sm:$0x1] %v1040_v12 }
  0x32   : > { %v392_v7 = vld [vmem:[#allocation7] sm:$0xff]  ;;  %v415_v9 = vsel %vm413_vm0, %v722_v3, 0  ;;  %391 = vst [vmem:[#allocation4] sm:$0x1] %v1040_v12 }
  0x33   : > { %424 = vmatpush.bf16.msra.mxu0 %v415_v9  ;;  %v394_v11 = vpack.c.bf16 %v393_v8, %v392_v7 }
  0x34   : > { %454 = vmatpush.bf16.msra.mxu1 %v738_v6 }
  0x36   : > { %723 = vmatmul.msk.bf16.vlgmr.msra.gmra.mxu0 %vm409_vm1, %v401_v10 }
  0x37   : > { %732 = vmatmul.msk.bf16.vlgmr.msra.gmra.mxu1 %vm443_vm2, %v394_v11 }
  0x38   : > { %v480_v37 = vld [vmem:[#allocation3] sm:$0x1] }
  0x39   : > { %v490_v40 = vld [vmem:[#allocation4] sm:$0x1] }
  0xb3   : > { %v426_v13 = vpop.f32.mrf.mxu0 }
  0xb4   : > { %v456_v14 = vpop.f32.mrf.mxu1 }
  0xb5   : > { %v457_v15 = vadd.f32 %v456_v14, %v426_v13 }
  0xb7   : > { %v461_v16 = vpack.c.bf16 %v457_v15, %v457_v15 }
  0xb9   : > { %v463_v20 = vunpack.c.l.bf16 %v461_v16 }
  0xbb   : > { %v428_v17 = vpop.f32.mrf.mxu0  ;;  %v491_v24 = vmul.f32 %v463_v20, %v463_v20 }
  0xbc   : > { %v458_v18 = vpop.f32.mrf.mxu1 }
  0xbd   : > { %v459_v19 = vadd.f32 %v458_v18, %v428_v17 }
  0xbf   : > { %v462_v21 = vpack.c.bf16 %v459_v19, %v459_v19  ;;  %v744_v22 = vpack.c.bf16 %v459_v19, %v457_v15 }
  0xc1   : > { %v464_v23 = vunpack.c.l.bf16 %v462_v21  ;;  %745 = vst [vmem:[#allocation2] sm:$0xff] %v744_v22  }
  0xc3   : > { %v481_v25 = vadd.f32 %v464_v23, %v463_v20  ;;  %v492_v26 = vmul.f32 %v464_v23, %v464_v23 }
  0xc5   : > { %v482_v27 = vrot.slane %v481_v25, 4  ;;  %v493_v28 = vadd.f32 %v492_v26, %v491_v24 }
  0xc7   : > { %v483_v29 = vadd.f32 %v482_v27, %v481_v25  ;;  %v494_v30 = vrot.slane %v493_v28, 4 }
  0xc9   : > { %v484_v31 = vrot.slane %v483_v29, 2  ;;  %v495_v32 = vadd.f32 %v494_v30, %v493_v28 }
  0xcb   : > { %v485_v33 = vadd.f32 %v484_v31, %v483_v29  ;;  %v496_v34 = vrot.slane %v495_v32, 2 }
  0xcd   : > { %v486_v35 = vrot.slane %v485_v33, 1  ;;  %v497_v36 = vadd.f32 %v496_v34, %v495_v32 }
  0xcf   : > { %v487_v38 = vadd.f32 %v486_v35, %v485_v33  ;;  %v498_v39 = vrot.slane %v497_v36, 1 }
  0xd1   : > { %v488_v41 = vadd.f32 %v487_v38, %v480_v37  ;;  %v499_v42 = vadd.f32 %v498_v39, %v497_v36 }
  0xd3   : > { %489 = vst [vmem:[#allocation3] sm:$0x1] %v488_v41  ;;  %v500_v43 = vadd.f32 %v499_v42, %v490_v40 }
  0xd5   : > { %501 = vst [vmem:[#allocation4] sm:$0x1] %v500_v43 }
  0xd6 PF: > { %p733_p12 = scmp.ne.s32.totalorder %s1022_s21, 1 }
  0xd8   : > { %510 = sbr.rel (%p733_p12) target bundleno = 268 (0x10c), region = 72 }
  0xdd   : > { %v515_v44 = vld [vmem:[#allocation3] sm:$0x1]  ;;  %v517_v45 = vld [vmem:[#allocation4] sm:$0x1]  ;;  %v522_v57 = vld [vmem:[%s1176_s4] sm:$0x1] }
  0xde   : > { %v516_v46 = vmul.f32 0.0625, %v515_v44  ;;  %v518_v47 = vmul.f32 0.0625, %v517_v45  ;;  %v536_v61 = vld [vmem:[%s1177_s5] sm:$0x1] }
  0xdf   : > { %v747_v0 = vld [vmem:[#allocation2] sm:$0xff]  }
  0xe0   : > { %v519_v48 = vmul.f32 %v516_v46, %v516_v46  ;;  %v748_v1 = vunpack.c.l.bf16 %v747_v0  ;;  %v749_v2 = vunpack.c.h.bf16 %v747_v0 }
  0xe2   : > { %v520_v49 = vsub.f32 %v518_v47, %v519_v48 }
  0xe4   : > { %v521_v50 = vmax.f32 %v520_v49, 0.0 }
  0xe6   : > { %v523_v51 = vadd.f32 1e-05, %v521_v50 }
  0xe8   : > { %838 = vrsqrt.f32 %v523_v51  ;;  %vm530_vm3 = vweird.f32 %v523_v51 }
  0xee   : > { %v839_v52 = vpop.eup %838 }
  0xef   : > { %v525_v53 = vmul.f32 %v839_v52, %v523_v51  ;;  %vm531_vm4 = vweird.f32 %v839_v52 }
  0xf0   : > { %vm532_vm5 = vmor %vm530_vm3, %vm531_vm4 }
  0xf1   : > { %v526_v54 = vmul.f32 %v839_v52, %v525_v53 }
  0xf3   : > { %v527_v55 = vmul.f32 0.5, %v526_v54 }
  0xf5   : > { %v528_v56 = vsub.f32 1.5, %v527_v55 }
  0xf7   : > { %v529_v58 = vmul.f32 %v839_v52, %v528_v56 }
  0xf9   : > { %v533_v59 = vsel %vm532_vm5, %v839_v52, %v529_v58 }
  0xfa   : > { %v534_v60 = vmul.f32 %v533_v59, %v522_v57 }
  0xfc   : > { %535 = vst [vmem:[#allocation5] sm:$0x1] %v534_v60  ;;  %v537_v62 = vmul.f32 %v534_v60, %v516_v46 }
  0xfe   : > { %v538_v63 = vsub.f32 %v536_v61, %v537_v62 }
 0x100   : > { %539 = vst [vmem:[#allocation6] sm:$0x1] %v538_v63 }
 0x103   : > { %v836_v3 = vld [vmem:[#allocation5] ss:$0 sm:$0xff] }
 0x104   : > { %v551_v4 = vmul.f32 %v836_v3, %v748_v1  ;;  %v552_v5 = vmul.f32 %v836_v3, %v749_v2 }
 0x107   : > { %v837_v6 = vld [vmem:[#allocation6] ss:$0 sm:$0xff] }
 0x108   : > { %v557_v7 = vadd.f32 %v837_v6, %v551_v4  ;;  %v558_v8 = vadd.f32 %v837_v6, %v552_v5 }
 0x10a   : > { %559 = vst [vmem:[#allocation15] sm:$0xff] %v557_v7 }
 0x10b   : > { %560 = vst [vmem:[#allocation15 + $0x8] sm:$0xff] %v558_v8 }
 0x10c PF: > { %p797_p13 = scmp.eq.s32.totalorder %s1095_s24, 1  ;;  %s577_s19 = sshll.u32 %s1178_s6, 4  ;;  %s578_s19 = int_to_ptr.hbm [resolvable:$true] %s577_s19 }
 0x10d   : > { %s1041_s20 = smov [#allocation15]   ;;  %s1042_s29 = smov 128  }
 0x10e   : > { %s575_s28 = sshll.u32 %s1041_s20, 4  ;;  %s1043_s7 = smov 8   ;;  %s576_s28 = int_to_ptr.vmem [resolvable:$true] %s575_s28 }
 0x10f   : > { %767 = dma.vmem_to_hbm [thread:$0]  (%p797_p13), %s576_s28, 256, %s578_s19, [#allocation9], %s1042_s29, %s1042_s29, %s1043_s7  }
 0x110 PF: > { %p799_p0 = scmp.eq.s32.totalorder %s706_s25, 1 }
 0x112   : > { %p785_p1 = pnand %p799_p0, %p710_p7 }
 0x114   : > { %p786_p2 = pneg %p785_p1 }
 0x116   : > { %1017 = dma.done.wait (%p786_p2), [#allocation9], 256  }
 0x117   : > { %1019 = vsyncadd (%p786_p2), [#allocation9], 4294967040  ;;  %s26_s23 = sadd.s32 1, %s1030_s23   ;;  %s1180_s21 = smov %s1026_s22 }
 0x118   : > { %p23_p3 = scmp.ge.s32.totalorder %s26_s23, 4   ;;  %s1181_s22 = smov %s1183_s26 }
 0x11a   :  { %25 = sbr.rel (!%p23_p3) target bundleno = 8 (0x8), region = 128 }
 0x11f   :  { %599 = vsyncpa [#allocation8], 1 }
 0x120   :  { %601 = vsyncpa [#allocation8 + $0x1], 1 }
 0x121   :  { %602 = vsyncpa [#allocation11], 1 }
 0x122   :  { %604 = vsyncpa [#allocation11 + $0x1], 1 }
 0x123   :  { %605 = vsyncpa [#allocation14], 1 }
 0x124   :  { %606 = vsyncpa [#allocation9], 1 }
 0x125   :  { %608 = vsyncpa [#allocation9 + $0x1], 1 }

</bundles_post_ra>
